<compile_context>
chip_gen: v7x
topology: tpu7x:2x2x1
jax: 0.10.0
libtpu: 0.0.40
codegen_flags: <defaults>
</compile_context>

<pallas_src>
import functools

import jax
import jax.numpy as jnp
from jax.experimental import pallas as pl
from jax.experimental.pallas import tpu as pltpu

_LANE = 128


def _round_up(x, m):
    return ((x + m - 1) // m) * m


def _vmem_capacity_bytes():
    try:
        return int(pltpu.get_tpu_info().vmem_capacity_bytes)
    except Exception:
        return 64 * 1024 * 1024  # conservative default: v7x per-TensorCore VMEM


def _sanitize_tile(t, full):
    """Tiles must be a multiple of 128 (lane-dense out block) unless they cover the axis."""
    if t >= full:
        return int(full)
    return int(max(_LANE, (t // _LANE) * _LANE))


def _bilinear_kernel(b_ref, x_ref, y_ref, w_ref, o_ref, *, d_total, tile_k, precision):
    """One (batch-tile i, feature-tile k) grid step.

    x_ref: (tile_n, D)       input dtype (full feature dim, resident across k)
    y_ref: (tile_n, tile_k)  input dtype
    w_ref: (D, tile_k)       input dtype
    b_ref: (1,) f32 in SMEM
    o_ref: (1, tile_n) f32   lane-dense logits row, accumulated over the k axis.
    """
    k = pl.program_id(1)

    @pl.when(k == 0)
    def _():
        # Initialize the resident output block with the bias exactly once per batch tile.
        o_ref[...] = jnp.full(o_ref.shape, b_ref[0], jnp.float32)

    # MXU: contract the full feature dim of x against a tile_k-wide slab of W
    # (native input dtype in, f32 accumulation out).
    xw = jnp.dot(x_ref[...], w_ref[...],
                 preferred_element_type=jnp.float32, precision=precision)  # (tn, tk) f32
    z = xw * y_ref[...].astype(jnp.float32)                                # VPU, f32

    if d_total % tile_k != 0:
        # Ragged feature tail: zero out-of-range columns of the last k block so the
        # reduction below only sees valid features.
        col = k * tile_k + jax.lax.broadcasted_iota(jnp.int32, z.shape, 1)
        z = jnp.where(col < d_total, z, 0.0)

    # Lane-dense per-row sums: (1, tile_n) = ones(1, tile_k) . z^T  (MXU "NT" form),
    # so the store below is an unmasked full-lane write.
    ones_row = jnp.ones((1, z.shape[1]), jnp.float32)
    part = jax.lax.dot_general(
        ones_row, z,
        dimension_numbers=(((1,), (1,)), ((), ())),
        preferred_element_type=jnp.float32, precision=precision)
    o_ref[...] += part


def _choose_tiles(n, d, itemsize, vmem_budget, *, num_cores):
    w_bytes = d * d * itemsize

    # Feature (K) axis: keep W resident (single-buffered) when it fits comfortably,
    # otherwise stream it in (D, tile_k) slabs (double-buffered) over a reduction axis.
    if w_bytes <= int(0.45 * vmem_budget):
        tile_k = d
    else:
        per_col = 2 * d * itemsize                       # double-buffered (D, tile_k) slabs
        tile_k = (int(0.35 * vmem_budget) // per_col) // _LANE * _LANE
        tile_k = max(_LANE, tile_k)
        if tile_k >= d:
            tile_k = d
    k_tiles = pl.cdiv(d, tile_k)
    w_vmem = w_bytes if k_tiles == 1 else 2 * d * tile_k * itemsize

    # Batch (N) axis: VMEM per row = x (2 bufs, full D) + y (2 bufs, tile_k wide)
    # + lane-dense f32 output row (negligible).
    per_row = 2 * d * itemsize + 2 * tile_k * itemsize + 64
    vmem_rows = max((vmem_budget - w_vmem) // per_row, _LANE)
    # Bytes-per-step target: ~4 MiB of x per grid step amortizes the ~0.35us/step
    # overhead; bigger tiles only add VMEM pressure.
    target_rows = max((4 * 1024 * 1024) // max(d * itemsize, 1), _LANE)
    tile_n = min(vmem_rows, target_rows)

    # >= 2 grid steps per TensorCore when the batch is big enough (megacore + pipelining).
    min_steps = 2 * max(int(num_cores), 1)
    if n >= min_steps * _LANE:
        tile_n = min(tile_n, _round_up(pl.cdiv(n, min_steps), _LANE))

    if tile_n >= n:
        tile_n = n                                        # single full block, any shape OK
    else:
        tile_n = max(_LANE, (tile_n // _LANE) * _LANE)    # lane-dense out block constraint
    return int(tile_n), int(tile_k)


def bilinear_discriminator(x, x_contrast, weight, bias, *,
                           tile_n=None, tile_k=None, vmem_budget_bytes=None,
                           num_cores=2, precision=None):
    """x, x_contrast: (N, D); weight: (D, D); bias: (1,). Returns (N, 1) f32 logits."""
    n, d = x.shape
    assert x_contrast.shape == (n, d)
    assert weight.shape == (d, d)

    in_dtype = x.dtype
    itemsize = jnp.dtype(in_dtype).itemsize

    # Feed the MXU in the input dtype (bf16 stays bf16 -> half the HBM bytes);
    # accumulation is f32 via preferred_element_type.
    x_contrast = x_contrast.astype(in_dtype)
    weight = weight.astype(in_dtype)
    bias = jnp.asarray(bias, jnp.float32).reshape((1,))

    capacity = _vmem_capacity_bytes()
    if vmem_budget_bytes is None:
        # ~48 MiB on v7x (64 MiB physical), ~96 MiB on v5e/v6e (128 MiB physical).
        vmem_budget_bytes = int(0.75 * capacity)
    vmem_budget_bytes = min(int(vmem_budget_bytes), int(0.8 * capacity))

    auto_n, auto_k = _choose_tiles(n, d, itemsize, vmem_budget_bytes, num_cores=num_cores)
    tile_n = auto_n if tile_n is None else _sanitize_tile(int(tile_n), n)
    tile_k = auto_k if tile_k is None else _sanitize_tile(int(tile_k), d)
    n_tiles = pl.cdiv(n, tile_n)
    k_tiles = pl.cdiv(d, tile_k)
    grid = (n_tiles, k_tiles)

    def _vmem_need(bufs):
        w_vmem = d * d * itemsize if k_tiles == 1 else 2 * d * tile_k * itemsize
        x_vmem = bufs * tile_n * d * itemsize
        y_vmem = bufs * tile_n * tile_k * itemsize
        o_vmem = 2 * pl.cdiv(tile_n, _LANE) * 4096
        return w_vmem + x_vmem + y_vmem + o_vmem

    # Deeper input buffering only when blocks are small (exposed DMA issue latency)
    # and there is VMEM slack.
    in_bufs = 2
    if tile_n * tile_k * itemsize < (1 << 20) and _vmem_need(3) <= vmem_budget_bytes:
        in_bufs = 3
    need = _vmem_need(in_bufs)

    # Generation-aware scoped-VMEM limit, clamped below physical capacity.
    vmem_limit = max(need + (8 << 20), 32 << 20)
    vmem_limit = min(vmem_limit, int(0.875 * capacity))
    vmem_limit = max(vmem_limit, min(need + (2 << 20), int(0.95 * capacity)))

    kernel = functools.partial(_bilinear_kernel, d_total=d, tile_k=tile_k,
                               precision=precision)
    compiler_params = pltpu.CompilerParams(
        dimension_semantics=("parallel", "arbitrary"),
        vmem_limit_bytes=int(vmem_limit))
    out_shape = jax.ShapeDtypeStruct((1, n), jnp.float32)

    def _call(use_pipeline_modes):
        w_kwargs, io_kwargs = {}, {}
        if use_pipeline_modes:
            if k_tiles == 1:
                # Grid-invariant weight: one resident buffer instead of two.
                w_kwargs = dict(pipeline_mode=pl.Buffered(1))
            if in_bufs != 2:
                io_kwargs = dict(pipeline_mode=pl.Buffered(in_bufs))
        in_specs = [
            pl.BlockSpec(memory_space=pltpu.SMEM),                              # bias
            pl.BlockSpec((tile_n, d), lambda i, k: (i, 0), **io_kwargs),        # x
            pl.BlockSpec((tile_n, tile_k), lambda i, k: (i, k), **io_kwargs),   # x_contrast
            pl.BlockSpec((d, tile_k), lambda i, k: (0, k), **w_kwargs),         # weight
        ]
        out_specs = pl.BlockSpec((1, tile_n), lambda i, k: (0, i))
        return pl.pallas_call(
            kernel,
            out_shape=out_shape,
            grid=grid,
            in_specs=in_specs,
            out_specs=out_specs,
            compiler_params=compiler_params,
        )(bias, x, x_contrast, weight)

    try:
        out_row = _call(True)
    except Exception:
        # Fallback for jax versions without BlockSpec(pipeline_mode=...): default
        # double-buffering everywhere (identical results, slightly more VMEM).
        out_row = _call(False)

    return out_row.reshape(n, 1)


if __name__ == "__main__":
    key = jax.random.PRNGKey(0)

    def ref_logits(x, y, w, b):
        return (jnp.einsum("ni,ij,nj->n",
                           x.astype(jnp.float32), w.astype(jnp.float32),
                           y.astype(jnp.float32),
                           precision=jax.lax.Precision.HIGHEST) + b)[:, None]

    def check(out, ref, name, atol, rtol):
        assert out.shape == ref.shape, (name, out.shape, ref.shape)
        assert bool(jnp.allclose(out, ref, atol=atol, rtol=rtol)), (
            name, float(jnp.max(jnp.abs(out - ref))))

    bias0 = jnp.zeros((1,), jnp.float32)  # bias.data.fill_(0.0) in the model

    def make(key, n, d, dtype):
        std = (2.0 / (d * d + d)) ** 0.5  # xavier_normal_ on (1, D, D)
        k1, k2, k3, key = jax.random.split(key, 4)
        x = jax.random.normal(k1, (n, d), jnp.float32).astype(dtype)
        y = jax.random.normal(k2, (n, d), jnp.float32).astype(dtype)
        w = (jax.random.normal(k3, (d, d), jnp.float32) * std).astype(dtype)
        return x, y, w, key

    # Case 1: f32, small D/N, default tile chooser (single block, resident weight).
    x, y, w, key = make(key, 40, 32, jnp.float32)
    out = jax.block_until_ready(bilinear_discriminator(x, y, w, bias0))
    check(out, ref_logits(x, y, w, bias0[0]), "case1", 5e-2, 5e-2)

    # Case 2: f32, ragged multi-step batch grid (no wrapper-side padding).
    x, y, w, key = make(key, 300, 32, jnp.float32)
    out = jax.block_until_ready(bilinear_discriminator(x, y, w, bias0, tile_n=128))
    check(out, ref_logits(x, y, w, bias0[0]), "case2", 5e-2, 5e-2)

    # Case 3: f32, streamed-weight path (K grid axis) with ragged feature tail + bias.
    x, y, w, key = make(key, 300, 200, jnp.float32)
    bias3 = jnp.full((1,), 0.25, jnp.float32)
    out = jax.block_until_ready(
        bilinear_discriminator(x, y, w, bias3, tile_n=128, tile_k=128))
    check(out, ref_logits(x, y, w, bias3[0]), "case3", 5e-2, 5e-2)

    # Case 4: bf16 inputs/weight fed natively to the MXU (f32 accumulation in-kernel).
    x, y, w, key = make(key, 300, 64, jnp.bfloat16)
    out = jax.block_until_ready(bilinear_discriminator(x, y, w, bias0, tile_n=128))
    check(out, ref_logits(x, y, w, bias0[0]), "case4", 5e-2, 5e-2)

    print("KERNEL_OK")
</pallas_src>

<mosaic_0001>
module attributes {stable_mosaic.version = 11 : i64} {
  func.func @_bilinear_kernel(%arg0: i32, %arg1: i32, %arg2: memref<1xf32, #tpu.memory_space<smem>>, %arg3: memref<40x32xf32, #tpu.memory_space<vmem>>, %arg4: memref<40x32xf32, #tpu.memory_space<vmem>>, %arg5: memref<32x32xf32, #tpu.memory_space<vmem>>, %arg6: memref<1x40xf32, #tpu.memory_space<vmem>>) attributes {dimension_semantics = [#tpu.dimension_semantics<parallel>, #tpu.dimension_semantics<arbitrary>], iteration_bounds = array<i64: 1, 1>, scalar_prefetch = 0 : i64, scratch_operands = 0 : i64, tpu.core_type = #tpu.core_type<tc>, window_params = [{transform_indices = @transform_0, window_bounds = array<i64: 1>}, {transform_indices = @transform_1, window_bounds = array<i64: 40, 32>}, {transform_indices = @transform_2, window_bounds = array<i64: 40, 32>}, {transform_indices = @transform_3, window_bounds = array<i64: 32, 32>}, {transform_indices = @transform_4, window_bounds = array<i64: 1, 40>}]} {
    %c0_i32 = arith.constant 0 : i32
    %0 = arith.cmpi eq, %arg1, %c0_i32 : i32
    %1 = arith.extui %0 : i1 to i32
    %c0_i32_0 = arith.constant 0 : i32
    %2 = arith.cmpi ne, %1, %c0_i32_0 : i32
    scf.if %2 {
      %c0_12 = arith.constant 0 : index
      %13 = memref.load %arg2[%c0_12] : memref<1xf32, #tpu.memory_space<smem>>
      %14 = vector.broadcast %13 : f32 to vector<1x40xf32>
      %c0_13 = arith.constant 0 : index
      %c0_14 = arith.constant 0 : index
      %15 = vector.load %arg6[%c0_13, %c0_14] : memref<1x40xf32, #tpu.memory_space<vmem>>, vector<1x40xf32>
      tpu.vector_store %arg6[%c0_13, %c0_14], %14 {strides = array<i32>} : memref<1x40xf32, #tpu.memory_space<vmem>>, vector<1x40xf32>,
    } else {
    }
    %c0 = arith.constant 0 : index
    %c0_1 = arith.constant 0 : index
    %3 = vector.load %arg3[%c0, %c0_1] : memref<40x32xf32, #tpu.memory_space<vmem>>, vector<40x32xf32>
    %c0_2 = arith.constant 0 : index
    %c0_3 = arith.constant 0 : index
    %4 = vector.load %arg5[%c0_2, %c0_3] : memref<32x32xf32, #tpu.memory_space<vmem>>, vector<32x32xf32>
    %cst = arith.constant dense<0.000000e+00> : vector<40x32xf32>
    %5 = tpu.matmul %3, %4, %cst {dimension_numbers = #tpu.dot_dimension_numbers<[1], [0], [0], [1], [0, 0, 1, 1], [], []>} : vector<40x32xf32>, vector<32x32xf32>, vector<40x32xf32> -> vector<40x32xf32>
    %c0_4 = arith.constant 0 : index
    %c0_5 = arith.constant 0 : index
    %6 = vector.load %arg4[%c0_4, %c0_5] : memref<40x32xf32, #tpu.memory_space<vmem>>, vector<40x32xf32>
    %7 = arith.mulf %5, %6 : vector<40x32xf32>
    %cst_6 = arith.constant 1.000000e+00 : f32
    %8 = vector.broadcast %cst_6 : f32 to vector<1x32xf32>
    %cst_7 = arith.constant dense<0.000000e+00> : vector<1x40xf32>
    %9 = tpu.matmul %8, %7, %cst_7 {dimension_numbers = #tpu.dot_dimension_numbers<[1], [1], [0], [0], [0, 0, 1, 0], [], []>} : vector<1x32xf32>, vector<40x32xf32>, vector<1x40xf32> -> vector<1x40xf32>
    %c0_8 = arith.constant 0 : index
    %c0_9 = arith.constant 0 : index
    %10 = vector.load %arg6[%c0_8, %c0_9] : memref<1x40xf32, #tpu.memory_space<vmem>>, vector<1x40xf32>
    %11 = arith.addf %10, %9 : vector<1x40xf32>
    %c0_10 = arith.constant 0 : index
    %c0_11 = arith.constant 0 : index
    %12 = vector.load %arg6[%c0_10, %c0_11] : memref<1x40xf32, #tpu.memory_space<vmem>>, vector<1x40xf32>
    tpu.vector_store %arg6[%c0_10, %c0_11], %11 {strides = array<i32>} : memref<1x40xf32, #tpu.memory_space<vmem>>, vector<1x40xf32>,
    return
  }
  func.func @transform_0(%arg0: i32, %arg1: i32) -> i32 {
    %c0_i32 = arith.constant 0 : i32
    %c0_i32_0 = arith.constant 0 : i32
    return %c0_i32 : i32
  }
  func.func @transform_1(%arg0: i32, %arg1: i32) -> (i32, i32) {
    %c0_i32 = arith.constant 0 : i32
    %c0_i32_0 = arith.constant 0 : i32
    return %arg0, %c0_i32 : i32, i32
  }
  func.func @transform_2(%arg0: i32, %arg1: i32) -> (i32, i32) {
    %c0_i32 = arith.constant 0 : i32
    return %arg0, %arg1 : i32, i32
  }
  func.func @transform_3(%arg0: i32, %arg1: i32) -> (i32, i32) {
    %c0_i32 = arith.constant 0 : i32
    %c0_i32_0 = arith.constant 0 : i32
    return %c0_i32, %arg1 : i32, i32
  }
  func.func @transform_4(%arg0: i32, %arg1: i32) -> (i32, i32) {
    %c0_i32 = arith.constant 0 : i32
    %c0_i32_0 = arith.constant 0 : i32
    return %c0_i32, %arg0 : i32, i32
  }
}

</mosaic_0001>

<bundles_post_ra>
// kernel: tpu_custom_call.1
= control target key start
LH: loop header
LB: loop body
LE: loop exit
PB: predicated region body
PF: predicated region fallthrough
CT: control target
= control target key end

     0   :  { %v363_v3 = vmov 0.0|0.0   ;;  %vm364_vm0 = vmmov 0   ;;  %v365_v6 = vmov 0.0   ;;  %s467_s0 = inlined_call_operand.<no memory space> [shape: f32[1], index: 0, kind: input, shape index: {}]   ;;  %s468_s1 = inlined_call_operand.vmem [shape: f32[40,32], index: 1, kind: input, shape index: {}]   ;;  %s469_s2 = inlined_call_operand.vmem [shape: f32[40,32], index: 2, kind: input, shape index: {}]   ;;  %s470_s3 = inlined_call_operand.vmem [shape: f32[32,32], index: 3, kind: input, shape index: {}]   ;;  %s471_s4 = inlined_call_operand.hbm [shape: f32[1,40], index: 4, kind: output, shape index: {}]  }
   0x1   :  { %v32_v0 = vld [vmem:[%s470_s3] sm:$0xff]  ;;  %v33_v1 = vld [vmem:[%s470_s3 + $0x8] sm:$0xff]  ;;  %v34_v2 = vld [vmem:[%s470_s3 + $0x10] sm:$0xff]  ;;  %320 = vmatprep.subr.bf16.mxu0 %v363_v3  ;;  %292 = vmatprep.mubr.msk.f32.mxu0 %vm364_vm0, %v365_v6 }
   0x2   :  { %v321_v4 = vpack.c.bf16 %v33_v1, %v32_v0  ;;  %v35_v5 = vld [vmem:[%s470_s3 + $0x18] sm:$0xff]  ;;  %326 = vmatprep.subr.bf16.mxu1 %v363_v3  ;;  %317 = vmatprep.mubr.msk.f32.mxu1 %vm364_vm0, %v365_v6 }
   0x3   :  { %v324_v7 = vpack.c.bf16 %v35_v5, %v34_v2 }
   0x4   :  { %322 = vmatpush3.bf16.msra.mxu0 %v321_v4 }
   0x5   :  { %10 = vsyncpa [#allocation4], 0  ;;  %323 = vmatprep.subr.bf16.mxu0 %v363_v3  ;;  %v27_v8 = vld [vmem:[%s468_s1] sm:$0xff]  ;;  %vm36_vm1 = vcmask 261120   ;;  %v28_v9 = vld [vmem:[%s468_s1 + $0x8] sm:$0xff]  ;;  %v24_v13 = vstv %s467_s0  ;;  %vm25_vm2 = vcmask 319488  }
   0x6   :  { %v29_v10 = vld [vmem:[%s468_s1 + $0x10] sm:$0xff]  ;;  %v30_v11 = vld [vmem:[%s468_s1 + $0x18] sm:$0xff]  ;;  %v31_v12 = vld [vmem:[%s468_s1 + $0x20] sm:$0xff]  ;;  %26 = vst.msk [vmem:[#allocation3] sm:$0x1] %vm25_vm2, %v24_v13  ;;  %v366_v36 = vmov 1.0  }
   0x7   :  { %v142_v16 = vld [vmem:[%s469_s2] sm:$0xff]  ;;  %v143_v17 = vld [vmem:[%s469_s2 + $0x8] sm:$0xff]  ;;  %vm328_vm3 = vmpackc.low %vm36_vm1, %vm36_vm1  ;;  %s367_s16 = smov [#allocation3]  }
   0x8   :  { %325 = vmatpush3.bf16.msra.mxu0 %v324_v7  ;;  %v144_v25 = vld [vmem:[%s469_s2 + $0x10] sm:$0xff]  ;;  %v145_v26 = vld [vmem:[%s469_s2 + $0x18] sm:$0xff]  ;;  %v146_v34 = vld [vmem:[%s469_s2 + $0x20] sm:$0xff]  ;;  %s250_s17 = sshll.u32 %s367_s16, 4  ;;  %s251_s17 = int_to_ptr.vmem [resolvable:$true] %s250_s17 }
   0x9   :  { %s339_s18 = scalar_lea.vmem %s251_s17, 16  ;;  %s343_s19 = scalar_lea.vmem %s251_s17, 32 }
   0xa   :  { %p340_p0 = scmp.ne.s32.totalorder %s251_s17, %s339_s18  ;;  %p344_p1 = scmp.lt.s32.totalorder %s251_s17, %s251_s17 }
   0xb   :  { %293 = vmatmul.mubr.msk.f32.vlgmr.msra.gmra.mrb[0].mxu0 %vm36_vm1, %v27_v8  ;;  %p345_p2 = scmp.lt.s32.totalorder %s343_s19, %s339_s18 }
   0xc   :  { %295 = vmatprep.mubr.msk.f32.mxu0 %vm364_vm0, %v365_v6 }
   0xd   :  { %v240_v37 = vld [vmem:[#allocation3] sm:$0x1]  ;;  %p346_p3 = por %p345_p2, %p344_p1 }
   0xf   :  { %296 = vmatmul.mubr.msk.f32.gmra.mrb[2].mxu0 %vm36_vm1, %v28_v9  ;;  %p347_p4 = pnand %p346_p3, %p340_p0 }
  0x10   :  { %298 = vmatprep.mubr.msk.f32.mxu0 %vm364_vm0, %v365_v6 }
  0x13   :  { %299 = vmatmul.mubr.msk.f32.gmra.mrb[4].mxu0 %vm36_vm1, %v29_v10 }
  0x14   :  { %301 = vmatprep.mubr.msk.f32.mxu0 %vm364_vm0, %v365_v6 }
  0x17   :  { %302 = vmatmul.mubr.msk.f32.gmra.mrb[6].mxu0 %vm36_vm1, %v30_v11 }
  0x18   :  { %304 = vmatprep.mubr.msk.f32.mxu0 %vm364_vm0, %v365_v6 }
  0x1b   :  { %305 = vmatmul.mubr.msk.f32.gmra.mrb[8].mxu0 %vm36_vm1, %v31_v12 }
  0xde   :  { %v118_v14 = vpop.f32.mrb[0].mxu0 }
  0xdf   :  { %v294_v15 = vpop.f32.mrb[1].mxu0  ;;  %v147_v19 = vmul.f32 %v142_v16, %v118_v14 }
  0xe2   :  { %v123_v18 = vpop.f32.mrb[2].mxu0 }
  0xe3   :  { %v148_v20 = vmul.f32 %v143_v17, %v123_v18  ;;  %v297_v21 = vpop.f32.mrb[3].mxu0 }
  0xe5   :  { %v327_v22 = vpack.c.bf16 %v148_v20, %v147_v19 }
  0xe6   :  { %v128_v23 = vpop.f32.mrb[4].mxu0 }
  0xe7   :  { %v300_v24 = vpop.f32.mrb[5].mxu0  ;;  %329 = vmatpush3.bf16.xpose.msk.msra.mxu1 %vm328_vm3, %v327_v22  ;;  %v149_v28 = vmul.f32 %v144_v25, %v128_v23 }
  0xe8   :  { %330 = vmatprep.subr.bf16.mxu1 %v363_v3 }
  0xea   :  { %v133_v27 = vpop.f32.mrb[6].mxu0 }
  0xeb   :  { %v150_v29 = vmul.f32 %v145_v26, %v133_v27  ;;  %v303_v30 = vpop.f32.mrb[7].mxu0 }
  0xed   :  { %v331_v31 = vpack.c.bf16 %v150_v29, %v149_v28 }
  0xee   :  { %v138_v32 = vpop.f32.mrb[8].mxu0 }
  0xef   :  { %333 = vmatpush3.bf16.xpose.msk.msra.mxu1 %vm328_vm3, %v331_v31  ;;  %v306_v33 = vpop.f32.mrb[9].mxu0  ;;  %v151_v35 = vmul.f32 %v146_v34, %v138_v32 }
  0xf0   :  { %315 = vmatprep.subr.mxu1 %v365_v6 }
  0xf7   :  { %316 = vmatpush3.xpose.msk.msra.mxu1 %vm36_vm1, %v151_v35 }
  0xfa   :  { %318 = vmatmul.mubr.msk.f32.vlgmr.msra.gmra.mrb[0].mxu1 %vm36_vm1, %v366_v36 }
 0x1cd   :  { %v236_v38 = vpop.f32.mrb[0].mxu1 }
 0x1ce   :  { %v241_v39 = vadd.f32 %v240_v37, %v236_v38  ;;  %v319_v40 = vpop.f32.mrb[1].mxu1 }
 0x1d0   :  { %243 = vst.msk [vmem:[#allocation3] sm:$0x1] %vm25_vm2, %v241_v39 }
 0x1d1   :  { %350 = shalt.err (!%p347_p4)
}
 0x1d2   :  { %s351_s21 = scalar_lea.hbm %s471_s4, 16 }
 0x1d3   :  { %p352_p5 = scmp.ne.s32.totalorder %s471_s4, %s351_s21  ;;  %p355_p6 = scmp.lt.u32.totalorder %s351_s21, %s471_s4 }
 0x1d5   :  { %p357_p7 = pnand %p355_p6, %p352_p5 }
 0x1d7   :  { %360 = shalt.err (!%p357_p7)
}
 0x1d8   :  { %253 = dma.vmem_to_hbm [thread:$0]  %s251_s17, 16, %s471_s4, [#allocation4]  }
 0x1d9   :  { %361 = dma.done.wait [#allocation4], 16  }
 0x1da   :  { %362 = vsyncadd [#allocation4], 4294967280 }
 0x1db   :  { %257 = vsyncpa [#allocation4], 1 }

</bundles_post_ra>
